<compile_context>
chip_gen: v6e
topology: v6e:2x2x1
jax: 0.10.0
libtpu: 0.0.40
codegen_flags: <defaults>
</compile_context>

<pallas_src>
import functools

import jax
import jax.numpy as jnp
import numpy as np
from jax import lax
from jax.experimental import pallas as pl
from jax.experimental.pallas import tpu as pltpu


def _pick_block_j(n, target=512):
    """Largest multiple-of-128 divisor of n that is <= target."""
    t = min(target, n)
    for cand in range((t // 128) * 128, 0, -128):
        if n % cand == 0:
            return cand
    # No multiple-of-128 divisor: only degrade to a full-width block for small N where
    # the (N, N) score block is harmless; otherwise fail loudly instead of silently
    # blowing VMEM (the old fallback).
    if n <= 1024:
        return n
    raise ValueError(
        f"N={n} has no multiple-of-128 divisor <= {target}; pad H*W//2 to a "
        "multiple of 128 or pass block_j explicitly.")


@functools.lru_cache(maxsize=None)
def _vmem_limit_bytes():
    """VMEM budget with headroom: ~85% of physical, capped at 112 MiB.
    v5e/v6e (128 MiB) -> ~108 MiB; v7x (64 MiB per TC) -> ~54 MiB."""
    cap = 128 * 1024 * 1024
    try:
        cap = int(pltpu.get_tpu_info().vmem_capacity_bytes)
    except Exception:
        pass
    return min(int(cap * 0.85), 112 * 1024 * 1024)


@functools.lru_cache(maxsize=None)
def _use_bf16_exp():
    """bf16 exp only where the EUP/VPU handle bf16 natively (v6e/v7x)."""
    try:
        kind = jax.devices()[0].device_kind.lower()
    except Exception:
        return False
    return ("v6" in kind) or ("v7" in kind)


def _make_kernel(tj, use_bf16_exp):
    def kernel(q_ref, xtheta_ref, v_ref,
               wphi_ref, wg_ref, wmask_ref,
               out_ref, acc_ref):
        j = pl.program_id(1)
        f32 = jnp.float32
        bf16 = jnp.bfloat16

        # ---- once per batch: zero the (C, N) accumulator -------------------------
        @pl.when(j == 0)
        def _init():
            acc_ref[...] = jnp.zeros_like(acc_ref)

        # ---- per column block j ---------------------------------------------------
        # x_phi block (C, tj) from the streamed bf16 q tile.
        x_phi = jnp.dot(wphi_ref[...], q_ref[0],
                        preferred_element_type=f32).astype(bf16)       # (C, tj)

        # Scores for all rows i, columns in this block (bf16 MXU, f32 accumulate).
        s = jnp.dot(xtheta_ref[0], x_phi,
                    preferred_element_type=f32)                        # (N, tj)

        # torch Softmax(dim=1): normalize over i (axis 0) -> exact per j block.
        m = jnp.max(s, axis=0, keepdims=True)                          # (1, tj)
        if use_bf16_exp:
            e = jnp.exp((s - m).astype(bf16))                          # (N, tj) bf16
            denom = jnp.sum(e, axis=0, keepdims=True, dtype=f32)       # (1, tj) f32
        else:
            e = jnp.exp(s - m)                                         # (N, tj) f32
            denom = jnp.sum(e, axis=0, keepdims=True)                  # (1, tj) f32
        inv = pl.reciprocal(denom, approx=True)                        # (1, tj)

        # x_g block (C, tj) from the j slice of the resident bf16 v tile; fold the
        # softmax denominator into it (column-wise scale) instead of dividing e.
        start = pl.multiple_of(j * tj, tj)
        v_blk = v_ref[0, :, pl.ds(start, tj)]                          # (2C, tj)
        x_g = jnp.dot(wg_ref[...], v_blk,
                      preferred_element_type=f32) * inv                # (C, tj) f32

        # Accumulate (C, N): acc[c, i] += sum_{jj in blk} x_g[c, jj] * e[i, jj]
        acc_ref[...] += lax.dot_general(x_g.astype(bf16), e.astype(bf16),
                                        (((1,), (1,)), ((), ())),
                                        preferred_element_type=f32)    # (C, N)

        # ---- finalize: conv_mask (expanded) + residual, lane-dense (2C, N) write --
        @pl.when(j == pl.num_programs(1) - 1)
        def _finalize():
            mask = jnp.dot(wmask_ref[...], acc_ref[...],
                           preferred_element_type=f32)                 # (2C, N) f32
            out_ref[0] = (mask + v_ref[0].astype(f32)).astype(out_ref.dtype)

    return kernel


@functools.partial(jax.jit, static_argnames=("block_j",))
def nonlocal_block(q, k, v, w_phi, w_theta, w_g, w_mask, *, block_j=None):
    """q, k, v: (B, C, H, W) float32.  Weights are the 1x1-conv kernels:
    w_phi/w_theta/w_g: (C//2, C),  w_mask: (C, C//2)."""
    B, C, H, W = q.shape
    assert C % 2 == 0 and (H * W) % 2 == 0, \
        "NonLocalBlock's .view() requires even C and even H*W"
    N = (H * W) // 2
    C2 = 2 * C
    f32 = jnp.float32
    bf16 = jnp.bfloat16

    tj = _pick_block_j(N) if block_j is None else block_j
    assert N % tj == 0 and (tj == N or tj % 128 == 0)
    num_j = N // tj

    # Expand 1x1-conv weights so that conv-then-view == expanded matmul.
    eye2 = jnp.eye(2, dtype=f32)
    wphi_e = jnp.kron(w_phi.astype(f32), eye2)        # (C, 2C)
    wtheta_e = jnp.kron(w_theta.astype(f32), eye2)    # (C, 2C)
    wg_e = jnp.kron(w_g.astype(f32), eye2)            # (C, 2C)
    wmask_e = jnp.kron(w_mask.astype(f32), eye2)      # (2C, C), stays f32 (tiny)

    # Glue reshapes (row-major, identical to torch .view on contiguous NCHW), bf16.
    q_r = q.reshape(B, C2, N).astype(bf16)
    v_r = v.reshape(B, C2, N).astype(bf16)
    # Pre-project x_theta on the XLA side (fused with the transpose): (B, N, C) bf16.
    k_r = k.reshape(B, C2, N).astype(f32)
    xtheta = jnp.einsum('cd,bdn->bnc', wtheta_e, k_r).astype(bf16)

    grid_spec = pltpu.PrefetchScalarGridSpec(
        num_scalar_prefetch=0,
        grid=(B, num_j),                  # j (column-block reduction) innermost
        in_specs=[
            pl.BlockSpec((1, C2, tj), lambda b, j: (b, 0, j)),   # q: j-tile only
            pl.BlockSpec((1, N, C), lambda b, j: (b, 0, 0)),     # x_theta: resident/batch
            pl.BlockSpec((1, C2, N), lambda b, j: (b, 0, 0)),    # v: resident/batch
            pl.BlockSpec((C, C2), lambda b, j: (0, 0)),          # w_phi (bf16)
            pl.BlockSpec((C, C2), lambda b, j: (0, 0)),          # w_g   (bf16)
            pl.BlockSpec((C2, C), lambda b, j: (0, 0)),          # w_mask (f32)
        ],
        out_specs=pl.BlockSpec((1, C2, N), lambda b, j: (b, 0, 0)),
        scratch_shapes=[
            pltpu.VMEM((C, N), jnp.float32),     # (C, N) accumulator
        ],
    )

    out_r = pl.pallas_call(
        _make_kernel(tj, _use_bf16_exp()),
        out_shape=jax.ShapeDtypeStruct((B, C2, N), f32),
        grid_spec=grid_spec,
        compiler_params=pltpu.CompilerParams(
            dimension_semantics=("parallel", "arbitrary"),
            vmem_limit_bytes=_vmem_limit_bytes(),
        ),
    )(q_r, xtheta, v_r, wphi_e.astype(bf16), wg_e.astype(bf16), wmask_e)

    return out_r.reshape(B, C, H, W)


def reference(q, k, v, w_phi, w_theta, w_g, w_mask):
    """Pure-JAX replica of the PyTorch forward (for verification)."""
    B, C, H, W = q.shape
    IC = C // 2

    def conv1x1(x, w):
        return jnp.einsum('oi,bihw->bohw', w, x)

    x_phi = conv1x1(q, w_phi).reshape(B, C, -1)                            # (B, C, N)
    x_theta = conv1x1(k, w_theta).reshape(B, C, -1).transpose(0, 2, 1)     # (B, N, C)
    x_g = conv1x1(v, w_g).reshape(B, C, -1).transpose(0, 2, 1)             # (B, N, C)
    s = jnp.matmul(x_theta, x_phi)                                         # (B, N, N)
    a = jax.nn.softmax(s, axis=1)                                          # dim=1, as in torch
    y = jnp.matmul(a, x_g)                                                 # (B, N, C)
    y = y.transpose(0, 2, 1).reshape(B, IC, H, W)
    mask = conv1x1(y, w_mask)
    return mask + v


if __name__ == "__main__":
    key = jax.random.PRNGKey(0)
    B, C, H, W = 2, 4, 16, 16
    IC = C // 2

    ks = jax.random.split(key, 7)
    q = jax.random.normal(ks[0], (B, C, H, W), jnp.float32)
    k = jax.random.normal(ks[1], (B, C, H, W), jnp.float32)
    v = jax.random.normal(ks[2], (B, C, H, W), jnp.float32)
    # Deterministic synthetic 1x1-conv weights (bias=False in the module).
    w_phi   = jax.random.normal(ks[3], (IC, C), jnp.float32) * 0.1
    w_theta = jax.random.normal(ks[4], (IC, C), jnp.float32) * 0.1
    w_g     = jax.random.normal(ks[5], (IC, C), jnp.float32) * 0.1
    w_mask  = jax.random.normal(ks[6], (C, IC), jnp.float32) * 0.1

    out = nonlocal_block(q, k, v, w_phi, w_theta, w_g, w_mask)
    out = jax.block_until_ready(out)

    ref = reference(q, k, v, w_phi, w_theta, w_g, w_mask)
    # Tolerance loosened for the bf16 inputs/score/PV matmuls + approx reciprocal.
    np.testing.assert_allclose(np.asarray(out), np.asarray(ref), rtol=2e-2, atol=2e-2)
    print("KERNEL_OK")
</pallas_src>

<mosaic_0001>
module attributes {stable_mosaic.version = 11 : i64} {
  func.func @kernel(%arg0: i32, %arg1: i32, %arg2: memref<1x8x128xbf16, #tpu.memory_space<vmem>>, %arg3: memref<1x128x4xbf16, #tpu.memory_space<vmem>>, %arg4: memref<1x8x128xbf16, #tpu.memory_space<vmem>>, %arg5: memref<4x8xbf16, #tpu.memory_space<vmem>>, %arg6: memref<4x8xbf16, #tpu.memory_space<vmem>>, %arg7: memref<8x4xf32, #tpu.memory_space<vmem>>, %arg8: memref<1x8x128xf32, #tpu.memory_space<vmem>>, %arg9: memref<4x128xf32, #tpu.memory_space<vmem>>) attributes {dimension_semantics = [#tpu.dimension_semantics<parallel>, #tpu.dimension_semantics<arbitrary>], iteration_bounds = array<i64: 2, 1>, scalar_prefetch = 0 : i64, scratch_operands = 1 : i64, tpu.core_type = #tpu.core_type<tc>, window_params = [{transform_indices = @transform_0, window_bounds = array<i64: 1, 8, 128>}, {transform_indices = @transform_1, window_bounds = array<i64: 1, 128, 4>}, {transform_indices = @transform_2, window_bounds = array<i64: 1, 8, 128>}, {pipeline_mode = #tpu.pipeline_mode<synchronous>, transform_indices = @transform_3, window_bounds = array<i64: 4, 8>}, {pipeline_mode = #tpu.pipeline_mode<synchronous>, transform_indices = @transform_4, window_bounds = array<i64: 4, 8>}, {pipeline_mode = #tpu.pipeline_mode<synchronous>, transform_indices = @transform_5, window_bounds = array<i64: 8, 4>}, {transform_indices = @transform_6, window_bounds = array<i64: 1, 8, 128>}]} {
    %c0_i32 = arith.constant 0 : i32
    %0 = arith.cmpi eq, %arg1, %c0_i32 : i32
    %1 = arith.extui %0 : i1 to i32
    %c0_i32_0 = arith.constant 0 : i32
    %2 = arith.cmpi ne, %1, %c0_i32_0 : i32
    scf.if %2 {
      %cst_23 = arith.constant 0.000000e+00 : f32
      %37 = vector.broadcast %cst_23 : f32 to vector<4x128xf32>
      %c0_24 = arith.constant 0 : index
      %c0_25 = arith.constant 0 : index
      %38 = vector.load %arg9[%c0_24, %c0_25] : memref<4x128xf32, #tpu.memory_space<vmem>>, vector<4x128xf32>
      tpu.vector_store %arg9[%c0_24, %c0_25], %37 {strides = array<i32>} : memref<4x128xf32, #tpu.memory_space<vmem>>, vector<4x128xf32>,
    } else {
    }
    %c0 = arith.constant 0 : index
    %c0_1 = arith.constant 0 : index
    %3 = vector.load %arg5[%c0, %c0_1] : memref<4x8xbf16, #tpu.memory_space<vmem>>, vector<4x8xbf16>
    %c0_2 = arith.constant 0 : index
    %c0_3 = arith.constant 0 : index
    %c0_4 = arith.constant 0 : index
    %4 = vector.load %arg2[%c0_2, %c0_3, %c0_4] : memref<1x8x128xbf16, #tpu.memory_space<vmem>>, vector<1x8x128xbf16>
    %5 = vector.shape_cast %4 : vector<1x8x128xbf16> to vector<8x128xbf16>
    %cst = arith.constant dense<0.000000e+00> : vector<4x128xf32>
    %6 = tpu.matmul %3, %5, %cst {dimension_numbers = #tpu.dot_dimension_numbers<[1], [0], [0], [1], [0, 0, 1, 1], [], []>} : vector<4x8xbf16>, vector<8x128xbf16>, vector<4x128xf32> -> vector<4x128xf32>
    %7 = arith.truncf %6 : vector<4x128xf32> to vector<4x128xbf16>
    %c0_5 = arith.constant 0 : index
    %c0_6 = arith.constant 0 : index
    %c0_7 = arith.constant 0 : index
    %8 = vector.load %arg3[%c0_5, %c0_6, %c0_7] : memref<1x128x4xbf16, #tpu.memory_space<vmem>>, vector<1x128x4xbf16>
    %9 = vector.shape_cast %8 : vector<1x128x4xbf16> to vector<128x4xbf16>
    %cst_8 = arith.constant dense<0.000000e+00> : vector<128x128xf32>
    %10 = tpu.matmul %9, %7, %cst_8 {dimension_numbers = #tpu.dot_dimension_numbers<[1], [0], [0], [1], [0, 0, 1, 1], [], []>} : vector<128x4xbf16>, vector<4x128xbf16>, vector<128x128xf32> -> vector<128x128xf32>
    %cst_9 = arith.constant dense<0xFF800000> : vector<128xf32>
    %11 = vector.multi_reduction <maximumf>, %10, %cst_9 [0] : vector<128x128xf32> to vector<128xf32>
    %12 = vector.shape_cast %11 : vector<128xf32> to vector<1x128xf32>
    %13 = vector.broadcast %12 : vector<1x128xf32> to vector<128x128xf32>
    %14 = arith.subf %10, %13 : vector<128x128xf32>
    %15 = math.exp %14 : vector<128x128xf32>
    %cst_10 = arith.constant dense<0.000000e+00> : vector<128xf32>
    %16 = vector.multi_reduction <add>, %15, %cst_10 [0] : vector<128x128xf32> to vector<128xf32>
    %17 = vector.shape_cast %16 : vector<128xf32> to vector<1x128xf32>
    %18 = tpu.reciprocal %17 {approx = true} : vector<1x128xf32> -> vector<1x128xf32>
    %c128_i32 = arith.constant 128 : i32
    %19 = arith.muli %arg1, %c128_i32 : i32
    %20 = tpu.assume_multiple %19, 128 : i32
    %c0_11 = arith.constant 0 : index
    %c0_12 = arith.constant 0 : index
    %21 = arith.index_cast %20 : i32 to index
    %22 = vector.load %arg4[%c0_11, %c0_12, %21] : memref<1x8x128xbf16, #tpu.memory_space<vmem>>, vector<1x8x128xbf16>
    %23 = vector.shape_cast %22 : vector<1x8x128xbf16> to vector<8x128xbf16>
    %c0_13 = arith.constant 0 : index
    %c0_14 = arith.constant 0 : index
    %24 = vector.load %arg6[%c0_13, %c0_14] : memref<4x8xbf16, #tpu.memory_space<vmem>>, vector<4x8xbf16>
    %cst_15 = arith.constant dense<0.000000e+00> : vector<4x128xf32>
    %25 = tpu.matmul %24, %23, %cst_15 {dimension_numbers = #tpu.dot_dimension_numbers<[1], [0], [0], [1], [0, 0, 1, 1], [], []>} : vector<4x8xbf16>, vector<8x128xbf16>, vector<4x128xf32> -> vector<4x128xf32>
    %26 = vector.broadcast %18 : vector<1x128xf32> to vector<4x128xf32>
    %27 = arith.mulf %25, %26 : vector<4x128xf32>
    %c0_16 = arith.constant 0 : index
    %c0_17 = arith.constant 0 : index
    %28 = vector.load %arg9[%c0_16, %c0_17] : memref<4x128xf32, #tpu.memory_space<vmem>>, vector<4x128xf32>
    %29 = arith.truncf %27 : vector<4x128xf32> to vector<4x128xbf16>
    %30 = arith.truncf %15 : vector<128x128xf32> to vector<128x128xbf16>
    %cst_18 = arith.constant dense<0.000000e+00> : vector<4x128xf32>
    %31 = tpu.matmul %29, %30, %cst_18 {dimension_numbers = #tpu.dot_dimension_numbers<[1], [1], [0], [0], [0, 0, 1, 0], [], []>} : vector<4x128xbf16>, vector<128x128xbf16>, vector<4x128xf32> -> vector<4x128xf32>
    %32 = arith.addf %28, %31 : vector<4x128xf32>
    %c0_19 = arith.constant 0 : index
    %c0_20 = arith.constant 0 : index
    %33 = vector.load %arg9[%c0_19, %c0_20] : memref<4x128xf32, #tpu.memory_space<vmem>>, vector<4x128xf32>
    tpu.vector_store %arg9[%c0_19, %c0_20], %32 {strides = array<i32>} : memref<4x128xf32, #tpu.memory_space<vmem>>, vector<4x128xf32>,
    %c0_i32_21 = arith.constant 0 : i32
    %34 = arith.cmpi eq, %arg1, %c0_i32_21 : i32
    %35 = arith.extui %34 : i1 to i32
    %c0_i32_22 = arith.constant 0 : i32
    %36 = arith.cmpi ne, %35, %c0_i32_22 : i32
    scf.if %36 {
      %c0_23 = arith.constant 0 : index
      %c0_24 = arith.constant 0 : index
      %37 = vector.load %arg7[%c0_23, %c0_24] : memref<8x4xf32, #tpu.memory_space<vmem>>, vector<8x4xf32>
      %c0_25 = arith.constant 0 : index
      %c0_26 = arith.constant 0 : index
      %38 = vector.load %arg9[%c0_25, %c0_26] : memref<4x128xf32, #tpu.memory_space<vmem>>, vector<4x128xf32>
      %cst_27 = arith.constant dense<0.000000e+00> : vector<8x128xf32>
      %39 = tpu.matmul %37, %38, %cst_27 {dimension_numbers = #tpu.dot_dimension_numbers<[1], [0], [0], [1], [0, 0, 1, 1], [], []>} : vector<8x4xf32>, vector<4x128xf32>, vector<8x128xf32> -> vector<8x128xf32>
      %c0_28 = arith.constant 0 : index
      %c0_29 = arith.constant 0 : index
      %c0_30 = arith.constant 0 : index
      %40 = vector.load %arg4[%c0_28, %c0_29, %c0_30] : memref<1x8x128xbf16, #tpu.memory_space<vmem>>, vector<1x8x128xbf16>
      %41 = vector.shape_cast %40 : vector<1x8x128xbf16> to vector<8x128xbf16>
      %42 = arith.extf %41 : vector<8x128xbf16> to vector<8x128xf32>
      %43 = arith.addf %39, %42 : vector<8x128xf32>
      %c0_31 = arith.constant 0 : index
      %c0_32 = arith.constant 0 : index
      %c0_33 = arith.constant 0 : index
      %44 = vector.load %arg8[%c0_31, %c0_32, %c0_33] : memref<1x8x128xf32, #tpu.memory_space<vmem>>, vector<1x8x128xf32>
      %45 = vector.shape_cast %44 : vector<1x8x128xf32> to vector<8x128xf32>
      %46 = vector.shape_cast %43 : vector<8x128xf32> to vector<1x8x128xf32>
      tpu.vector_store %arg8[%c0_31, %c0_32, %c0_33], %46 {strides = array<i32>} : memref<1x8x128xf32, #tpu.memory_space<vmem>>, vector<1x8x128xf32>,
    } else {
    }
    return
  }
  func.func @transform_0(%arg0: i32, %arg1: i32) -> (i32, i32, i32) {
    %c0_i32 = arith.constant 0 : i32
    %c0_i32_0 = arith.constant 0 : i32
    return %arg0, %c0_i32, %arg1 : i32, i32, i32
  }
  func.func @transform_1(%arg0: i32, %arg1: i32) -> (i32, i32, i32) {
    %c0_i32 = arith.constant 0 : i32
    %c0_i32_0 = arith.constant 0 : i32
    %c0_i32_1 = arith.constant 0 : i32
    return %arg0, %c0_i32, %c0_i32_0 : i32, i32, i32
  }
  func.func @transform_2(%arg0: i32, %arg1: i32) -> (i32, i32, i32) {
    %c0_i32 = arith.constant 0 : i32
    %c0_i32_0 = arith.constant 0 : i32
    %c0_i32_1 = arith.constant 0 : i32
    return %arg0, %c0_i32, %c0_i32_0 : i32, i32, i32
  }
  func.func @transform_3(%arg0: i32, %arg1: i32) -> (i32, i32) {
    %c0_i32 = arith.constant 0 : i32
    %c0_i32_0 = arith.constant 0 : i32
    %c0_i32_1 = arith.constant 0 : i32
    return %c0_i32, %c0_i32_0 : i32, i32
  }
  func.func @transform_4(%arg0: i32, %arg1: i32) -> (i32, i32) {
    %c0_i32 = arith.constant 0 : i32
    %c0_i32_0 = arith.constant 0 : i32
    %c0_i32_1 = arith.constant 0 : i32
    return %c0_i32, %c0_i32_0 : i32, i32
  }
  func.func @transform_5(%arg0: i32, %arg1: i32) -> (i32, i32) {
    %c0_i32 = arith.constant 0 : i32
    %c0_i32_0 = arith.constant 0 : i32
    %c0_i32_1 = arith.constant 0 : i32
    return %c0_i32, %c0_i32_0 : i32, i32
  }
  func.func @transform_6(%arg0: i32, %arg1: i32) -> (i32, i32, i32) {
    %c0_i32 = arith.constant 0 : i32
    %c0_i32_0 = arith.constant 0 : i32
    %c0_i32_1 = arith.constant 0 : i32
    return %arg0, %c0_i32, %c0_i32_0 : i32, i32, i32
  }
}

</mosaic_0001>

<bundles_post_ra>
// kernel: nonlocal_block.1
= control target key start
LH: loop header
LB: loop body
LE: loop exit
PB: predicated region body
PF: predicated region fallthrough
CT: control target
= control target key end

     0   :  { %s1159_s21 = smov 0   ;;  %s1161_s22 = smov 0   ;;  %s1298_s0 = inlined_call_operand.vmem [shape: bf16[2,8,128], index: 0, kind: input, shape index: {}]   ;;  %s1299_s1 = inlined_call_operand.vmem [shape: bf16[2,128,4], index: 1, kind: input, shape index: {}]   ;;  %s1300_s2 = inlined_call_operand.vmem [shape: bf16[2,8,128], index: 2, kind: input, shape index: {}]   ;;  %s1301_s3 = inlined_call_operand.vmem [shape: bf16[4,8], index: 3, kind: input, shape index: {}]   ;;  %s1302_s4 = inlined_call_operand.vmem [shape: bf16[4,8], index: 4, kind: input, shape index: {}]   ;;  %s1303_s5 = inlined_call_operand.vmem [shape: f32[8,4], index: 5, kind: input, shape index: {}]   ;;  %s1304_s6 = inlined_call_operand.vmem [shape: f32[2,8,128], index: 6, kind: output, shape index: {}]  }
   0x1   :  { %s1163_s23 = smov 0  }
   0x2 LB: > { %s28_s24 = sadd.s32 1, %s1116_s22  ;;  %p921_p0 = scmp.ge.s32.totalorder %s1120_s23, 1  ;;  %s1120_s23 = sphi %s1163_s23, %s16_s23   ;;  %s1116_s22 = sphi %s1161_s22, %s1306_s22   ;;  %s1112_s21 = sphi %s1159_s21, %s1305_s21  }
   0x3   : > { %p30_p1 = scmp.ge.s32.totalorder %s28_s24, 2  ;;  %p247_p2 = scmp.lt.s32.totalorder %s1120_s23, 3 }
   0x5   : > { %s1308_s24 = smov (%p30_p1, %s28_s24), 0  ;;  %p248_p3 = pnand %p921_p0, %p247_p2 }
   0x6   : > { %p287_p4 = scmp.lt.s32.totalorder (!%p248_p3), %s1112_s21, 1 }
   0x7   : > { %251 = sbr.rel (%p248_p3) target bundleno = 953 (0x3b9), region = 44 }
   0xc   : > { %v1122_v0 = vmov 0.0   ;;  %vm1123_vm0 = vmmov 0   ;;  %s1310_s21 = smov (!%p287_p4, %s1112_s21), 1  ;;  %vm319_vm1 = vcmask 1043456   ;;  %v313_v2 = vld [vmem:[%s1301_s3] sm:$0x3] }
   0xd   : > { %974 = vmatprep.subr.bf16.mxu0 %v1122_v0  ;;  %312 = vst [vmem:[#allocation2] sm:$0xf] %v1122_v0  ;;  %976 = vmatprep.mubr.msk.bf16.mxu0 %vm1123_vm0, %v1122_v0  ;;  %s922_s25 = sshll.u32 %s1310_s21, 2  ;;  %s949_s26 = sshll.u32 %s1310_s21, 6  ;;  %vm315_vm2 = vcmask 64512   ;;  %vm420_vm3 = vcmask 31744  }
   0xe   : > { %1004 = vmatprep.subr.bf16.mxu1 %v1122_v0  ;;  %1020 = vmatprep.mubr.msk.bf16.mxu1 %vm1123_vm0, %v1122_v0  ;;  %s293_s29 = scalar_lea.vmem %s1298_s0, %s922_s25  ;;  %s1194_s8 = scalar_lea.vmem %s1299_s1, %s949_s26  ;;  %vm445_vm4 = vcmask 1041408   ;;  %v643_v20 = vld [vmem:[%s1302_s4] sm:$0x3] }
   0xf   : > { %v314_v1 = vld [vmem:[%s293_s29] sm:$0xf]  ;;  %s1206_s13 = scalar_lea.vmem %s1300_s2, %s922_s25  ;;  %v1057_v10 = vld [vmem:[%s1194_s8 + $0x8] sm:$0xff]   ;;  %v1058_v12 = vld [vmem:[%s1194_s8 + $0x10] sm:$0xff]   ;;  %s926_s18 = sshll.u32 %s1310_s21, 3 }
  0x10   : > { %v321_v3 = vsel %vm319_vm1, %v314_v1, 0  ;;  %v1056_v4 = vld [vmem:[%s1194_s8] sm:$0xff]   ;;  %v1059_v15 = vld [vmem:[%s1194_s8 + $0x18] sm:$0xff]   ;;  %v1061_v17 = vld [vmem:[%s1194_s8 + $0x28] sm:$0xff]   ;;  %s306_s25 = scalar_lea.vmem %s1304_s6, %s926_s18 }
  0x11   : > { %975 = vmatpush3.bf16.msra.mxu0 %v321_v3  ;;  %v642_v8 = vld [vmem:[%s1206_s13] sm:$0xf]  ;;  %v1062_v18 = vld [vmem:[%s1194_s8 + $0x30] sm:$0xff]   ;;  %v1063_v19 = vld [vmem:[%s1194_s8 + $0x38] sm:$0xff]  }
  0x12   : > { %v648_v13 = vsel %vm319_vm1, %v642_v8, 0  ;;  %v1060_v16 = vld [vmem:[%s1194_s8 + $0x20] sm:$0xff]  }
  0x14   : > { %977 = vmatmul.mubr.msk.bf16.vlgmr.msra.gmra.mxu0 %vm315_vm2, %v313_v2 }
  0x15   : > { %982 = vmatprep.mubr.msk.bf16.mxu0 %vm420_vm3, %v1056_v4 }
  0xd4   : > { %v357_v5 = vpop.f32.mrf.mxu0 }
  0xd5   : > { %v363_v6 = vpack.c.bf16 %v357_v5, %v357_v5 }
  0xd6   : > { %v978_v7 = vpop.f32.mrf.mxu0 }
  0xd7   : > { %v447_v9 = vsel %vm445_vm4, %v363_v6, 0  ;;  %1029 = vmatprep.subr.msk.bf16.mxu0 %vm445_vm4, %v363_v6 }
  0xd8   : > { %v360_v11 = vpop.f32.mrf.mxu0  ;;  %981 = vmatpush3.bf16.msra.mxu0 %v447_v9 }
  0xd9   : > { %998 = vmatprep.subr.bf16.mxu0 %v1122_v0 }
  0xda   : > { %v979_v14 = vpop.f32.mrf.mxu0 }
  0xdb   : > { %983 = vmatmul.mubr.msk.bf16.vlgmr.msra.gmra.mxu0 %vm420_vm3, %v1057_v10 }
  0xdc   : > { %986 = vmatprep.mubr.msk.bf16.mxu0 %vm420_vm3, %v1058_v12  ;;  %999 = vmatpush3.bf16.msra.mxu0 %v648_v13 }
  0xdd   : > { %1024 = vmatprep.subr.mxu0 %v1122_v0 }
  0xe3   : > { %987 = vmatmul.mubr.msk.bf16.gmra.mxu0 %vm420_vm3, %v1059_v15 }
  0xe4   : > { %990 = vmatprep.mubr.msk.bf16.mxu0 %vm420_vm3, %v1060_v16 }
  0xeb   : > { %991 = vmatmul.mubr.msk.bf16.gmra.mxu0 %vm420_vm3, %v1061_v17 }
  0xec   : > { %994 = vmatprep.mubr.msk.bf16.mxu0 %vm420_vm3, %v1062_v18 }
  0xf3   : > { %995 = vmatmul.mubr.msk.bf16.gmra.mxu0 %vm420_vm3, %v1063_v19 }
  0xf4   : > { %1000 = vmatprep.mubr.msk.bf16.mxu0 %vm1123_vm0, %v1122_v0 }
  0xfb   : > { %1001 = vmatmul.mubr.msk.bf16.vlgmr.msra.gmra.mxu0 %vm315_vm2, %v643_v20 }
  0xfc   : > { %1026 = vmatprep.mubr.msk.f32.mxu0 %vm1123_vm0, %v1122_v0 }
 0x19b   : > { %v984_v21 = vpop.f32.mrf.mxu0 }
 0x19d   : > { %v483_v22 = vpop.f32.mrf.mxu0 }
 0x19f   : > { %v985_v23 = vpop.f32.mrf.mxu0 }
 0x1a1   : > { %v486_v24 = vpop.f32.mrf.mxu0 }
 0x1a3   : > { %v988_v25 = vpop.f32.mrf.mxu0 }
 0x1a4   : > { %v548_v36 = vmax.f32 %v984_v21, %v988_v25 }
 0x1a5   : > { %v499_v26 = vpop.f32.mrf.mxu0 }
 0x1a6   : > { %v546_v37 = vmax.f32 %v483_v22, %v499_v26 }
 0x1a7   : > { %v989_v27 = vpop.f32.mrf.mxu0 }
 0x1a8   : > { %v549_v34 = vmax.f32 %v985_v23, %v989_v27 }
 0x1a9   : > { %v502_v28 = vpop.f32.mrf.mxu0 }
 0x1aa   : > { %v547_v38 = vmax.f32 %v486_v24, %v502_v28 }
 0x1ab   : > { %v1234_v29 = vpop.f32.mrf.mxu0 }
 0x1ac   : > { %v552_v41 = vmax.f32 %v548_v36, %v1234_v29 }
 0x1ad   : > { %v515_v30 = vpop.f32.mrf.mxu0 }
 0x1ae   : > { %v550_v42 = vmax.f32 %v546_v37, %v515_v30 }
 0x1af   : > { %v1236_v31 = vpop.f32.mrf.mxu0 }
 0x1b0   : > { %v553_v39 = vmax.f32 %v549_v34, %v1236_v31 }
 0x1b1   : > { %v1238_v32 = vpop.f32.mrf.mxu0 }
 0x1b2   : > { %v551_v43 = vmax.f32 %v547_v38, %v1238_v32 }
 0x1b3   : > { %v996_v33 = vpop.f32.mrf.mxu0 }
 0x1b4   : > { %v556_v46 = vmax.f32 %v552_v41, %v996_v33 }
 0x1b5   : > { %v1240_v35 = vpop.f32.mrf.mxu0 }
 0x1b6   : > { %v554_v47 = vmax.f32 %v550_v42, %v1240_v35 }
 0x1b7   : > { %v997_v40 = vpop.f32.mrf.mxu0 }
 0x1b8   : > { %v557_v44 = vmax.f32 %v553_v39, %v997_v40 }
 0x1b9   : > { %v1245_v45 = vpop.f32.mrf.mxu0 }
 0x1ba   : > { %v555_v48 = vmax.f32 %v551_v43, %v1245_v45  ;;  %v559_v50 = vmax.f32 %v556_v46, %v557_v44 }
 0x1bb   : > { %v1249_v49 = vpop.f32.mrf.mxu0 }
 0x1bc   : > { %v558_v51 = vmax.f32 %v554_v47, %v555_v48 }
 0x1bd   : > { %v1002_v52 = vpop.f32.mrf.mxu0 }
 0x1be   : > { %v560_v53 = vmax.f32 %v558_v51, %v559_v50 }
 0x1bf   : > { %v687_v54 = vpop.f32.mrf.mxu0 }
 0x1c0   : > { %v561_v55 = vrot.slane %v560_v53, 4 }
 0x1c1   : > { %v1003_v56 = vpop.f32.mrf.mxu0 }
 0x1c2   : > { %v562_v57 = vmax.f32 %v560_v53, %v561_v55 }
 0x1c4   : > { %v563_v58 = vrot.slane %v562_v57, 2 }
 0x1c6   : > { %v564_v59 = vmax.f32 %v562_v57, %v563_v58 }
 0x1c8   : > { %v565_v60 = vrot.slane %v564_v59, 1 }
 0x1ca   : > { %v566_v61 = vmax.f32 %v564_v59, %v565_v60 }
 0x1cc   : > { %v567_v62 = vsub.f32 %v483_v22, %v566_v61  ;;  %v568_v63 = vsub.f32 %v486_v24, %v566_v61  ;;  %v569_v1 = vsub.f32 %v984_v21, %v566_v61  ;;  %v570_v2 = vsub.f32 %v985_v23, %v566_v61 }
 0x1cd   : > { %v571_v3 = vsub.f32 %v499_v26, %v566_v61  ;;  %v573_v4 = vsub.f32 %v988_v25, %v566_v61  ;;  %v574_v7 = vsub.f32 %v989_v27, %v566_v61  ;;  %v572_v10 = vsub.f32 %v502_v28, %v566_v61 }
 0x1ce   : > { %v583_v5 = vmul.f32 1.442695, %v567_v62  ;;  %v585_v6 = vmul.f32 1.442695, %v568_v63  ;;  %v587_v8 = vmul.f32 1.442695, %v569_v1  ;;  %v575_v14 = vsub.f32 %v515_v30, %v566_v61 }
 0x1cf   : > { %v589_v9 = vmul.f32 1.442695, %v570_v2  ;;  %v591_v11 = vmul.f32 1.442695, %v571_v3  ;;  %v595_v12 = vmul.f32 1.442695, %v573_v4  ;;  %v581_v16 = vsub.f32 %v996_v33, %v566_v61 }
 0x1d0   : > { %1064 = vpow2.f32 %v583_v5  ;;  %v597_v13 = vmul.f32 1.442695, %v574_v7  ;;  %v593_v15 = vmul.f32 1.442695, %v572_v10  ;;  %v582_v17 = vsub.f32 %v997_v40, %v566_v61 }
 0x1d1   : > { %1066 = vpow2.f32 %v585_v6  ;;  %v576_v18 = vsub.f32 %v1238_v32, %v566_v61  ;;  %v599_v19 = vmul.f32 1.442695, %v575_v14  ;;  %v577_v20 = vsub.f32 %v1234_v29, %v566_v61 }
 0x1d2   : > { %1068 = vpow2.f32 %v587_v8  ;;  %v611_v21 = vmul.f32 1.442695, %v581_v16  ;;  %v578_v22 = vsub.f32 %v1236_v31, %v566_v61  ;;  %v613_v23 = vmul.f32 1.442695, %v582_v17  ;;  %v691_v17 = vld [vmem:[#allocation2] sm:$0xf] }
 0x1d3   : > { %1070 = vpow2.f32 %v589_v9  ;;  %v579_v24 = vsub.f32 %v1240_v35, %v566_v61  ;;  %v580_v26 = vsub.f32 %v1245_v45, %v566_v61  ;;  %v601_v27 = vmul.f32 1.442695, %v576_v18 }
 0x1d4   : > { %1072 = vpow2.f32 %v591_v11  ;;  %v603_v30 = vmul.f32 1.442695, %v577_v20  ;;  %v605_v33 = vmul.f32 1.442695, %v578_v22 }
 0x1d5   : > { %1074 = vpow2.f32 %v595_v12  ;;  %v607_v35 = vmul.f32 1.442695, %v579_v24  ;;  %v609_v36 = vmul.f32 1.442695, %v580_v26  ;;  %v748_v24 = vld [vmem:[%s1206_s13] sm:$0xf] }
 0x1d6   : > { %1076 = vpow2.f32 %v597_v13 }
 0x1d7   : > { %1078 = vpow2.f32 %v593_v15 }
 0x1d8   : > { %1080 = vpow2.f32 %v599_v19 }
 0x1d9   : > { %1082 = vpow2.f32 %v611_v21 }
 0x1da   : > { %1084 = vpow2.f32 %v613_v23 }
 0x1db   : > { %1086 = vpow2.f32 %v601_v27 }
 0x1dc   : > { %1088 = vpow2.f32 %v603_v30 }
 0x1dd   : > { %v1255_v25 = vpop.eup %1064  ;;  %1090 = vpow2.f32 %v605_v33 }
 0x1de   : > { %v1258_v28 = vpop.eup %1066  ;;  %1092 = vpow2.f32 %v607_v35 }
 0x1df   : > { %v1260_v32 = vpop.eup %1068  ;;  %v615_v29 = vadd.f32 %v1258_v28, %v1255_v25  ;;  %v693_v31 = vpack.c.bf16 %v1258_v28, %v1255_v25  ;;  %1094 = vpow2.f32 %v609_v36 }
 0x1e0   : > { %v1071_v34 = vpop.eup %1070 }
 0x1e1   : > { %v616_v37 = vadd.f32 %v1260_v32, %v615_v29  ;;  %v694_v38 = vpack.c.bf16 %v1071_v34, %v1260_v32  ;;  %v1073_v39 = vpop.eup %1072 }
 0x1e2   : > { %v1075_v40 = vpop.eup %1074 }
 0x1e3   : > { %v617_v41 = vadd.f32 %v1071_v34, %v616_v37  ;;  %v1077_v42 = vpop.eup %1076 }
 0x1e4   : > { %v696_v44 = vpack.c.bf16 %v1077_v42, %v1075_v40  ;;  %v1079_v45 = vpop.eup %1078 }
 0x1e5   : > { %v618_v43 = vadd.f32 %v1073_v39, %v617_v41  ;;  %v1081_v48 = vpop.eup %1080  ;;  %v695_v13 = vpack.c.bf16 %v1079_v45, %v1073_v39 }
 0x1e6   : > { %v1083_v50 = vpop.eup %1082 }
 0x1e7   : > { %v619_v46 = vadd.f32 %v1079_v45, %v618_v43  ;;  %v1085_v52 = vpop.eup %1084 }
 0x1e8   : > { %v700_v54 = vpack.c.bf16 %v1085_v52, %v1083_v50  ;;  %v1087_v55 = vpop.eup %1086 }
 0x1e9   : > { %v620_v47 = vadd.f32 %v1075_v40, %v619_v46  ;;  %v1089_v56 = vpop.eup %1088  ;;  %v697_v8 = vpack.c.bf16 %v1087_v55, %v1081_v48 }
 0x1ea   : > { %1005 = vmatpush3.bf16.xpose.msra.mxu1 %v700_v54  ;;  %v1091_v58 = vpop.eup %1090 }
 0x1eb   : > { %v621_v51 = vadd.f32 %v1077_v42, %v620_v47  ;;  %1006 = vmatprep.subr.bf16.mxu1 %v1122_v0  ;;  %v1093_v59 = vpop.eup %1092  ;;  %v698_v5 = vpack.c.bf16 %v1091_v58, %v1089_v56 }
 0x1ec   : > { %v1095_v61 = vpop.eup %1094 }
 0x1ed   : > { %v622_v53 = vadd.f32 %v1081_v48, %v621_v51  ;;  %v699_v1 = vpack.c.bf16 %v1095_v61, %v1093_v59 }
 0x1ef   : > { %v623_v57 = vadd.f32 %v1087_v55, %v622_v53 }
 0x1f1   : > { %v624_v60 = vadd.f32 %v1089_v56, %v623_v57 }
 0x1f2   : > { %1007 = vmatpush3.bf16.xpose.msra.mxu1 %v699_v1 }
 0x1f3   : > { %v625_v62 = vadd.f32 %v1091_v58, %v624_v60  ;;  %1008 = vmatprep.subr.bf16.mxu1 %v1122_v0 }
 0x1f5   : > { %v626_v63 = vadd.f32 %v1093_v59, %v625_v62 }
 0x1f7   : > { %v627_v2 = vadd.f32 %v1095_v61, %v626_v63 }
 0x1f9   : > { %v628_v3 = vadd.f32 %v1083_v50, %v627_v2 }
 0x1fa   : > { %1009 = vmatpush3.bf16.xpose.msra.mxu1 %v698_v5 }
 0x1fb   : > { %v629_v4 = vadd.f32 %v1085_v52, %v628_v3  ;;  %1010 = vmatprep.subr.bf16.mxu1 %v1122_v0 }
 0x1fd   : > { %v630_v6 = vrot.slane %v629_v4, 4 }
 0x1ff   : > { %v631_v7 = vadd.f32 %v630_v6, %v629_v4 }
 0x201   : > { %v632_v9 = vrot.slane %v631_v7, 2 }
 0x202   : > { %1011 = vmatpush3.bf16.xpose.msra.mxu1 %v697_v8 }
 0x203   : > { %1012 = vmatprep.subr.bf16.mxu1 %v1122_v0  ;;  %v633_v10 = vadd.f32 %v632_v9, %v631_v7 }
 0x205   : > { %v634_v11 = vrot.slane %v633_v10, 1 }
 0x207   : > { %v635_v12 = vadd.f32 %v634_v11, %v633_v10 }
 0x209   : > { %1096 = vrcp.f32 %v635_v12 }
 0x20a   : > { %1013 = vmatpush3.bf16.xpose.msra.mxu1 %v696_v44 }
 0x20b   : > { %1014 = vmatprep.subr.bf16.mxu1 %v1122_v0 }
 0x212   : > { %1015 = vmatpush3.bf16.xpose.msra.mxu1 %v695_v13 }
 0x213   : > { %1016 = vmatprep.subr.bf16.mxu1 %v1122_v0 }
 0x216   : > { %v1097_v14 = vpop.eup %1096 }
 0x217   : > { %v690_v15 = vmul.f32 %v1097_v14, %v1249_v49  ;;  %v749_v49 = vunpack.c.l.bf16 %v748_v24 }
 0x219   : > { %v692_v16 = vpack.c.bf16 %v690_v15, %v690_v15 }
 0x21a   : > { %1017 = vmatpush3.bf16.xpose.msra.mxu1 %v694_v38 }
 0x21b   : > { %1018 = vmatprep.subr.bf16.mxu1 %v1122_v0  ;;  %v746_v0 = vld [vmem:[%s1303_s5] sm:$0xff] }
 0x222   : > { %1019 = vmatpush3.bf16.xpose.msra.mxu1 %v693_v31 }
 0x229   : > { %1021 = vmatmul.mubr.bf16.vlgmr.msra.gmra.mxu1 %v692_v16 }
 0x2e9   : > { %v735_v18 = vpop.f32.mrf.mxu1 }
 0x2ea   : > { %v741_v19 = vadd.f32 %v735_v18, %v691_v17 }
 0x2eb   : > { %v1022_v20 = vpop.f32.mrf.mxu1 }
 0x2ec   : > { %742 = vst [vmem:[#allocation2] sm:$0xf] %v741_v19 }
 0x2ed   : > { %v738_v21 = vpop.f32.mrf.mxu1 }
 0x2ef   : > { %v1023_v22 = vpop.f32.mrf.mxu1 }
 0x2f3   : > { %v747_v23 = vld [vmem:[#allocation2] sm:$0xf] }
 0x2f4   : > { %1025 = vmatpush3.msk.msra.mxu0 %vm319_vm1, %v747_v23 }
 0x2f5   : > { %1027 = vmatmul.mubr.msk.f32.vlgmr.msra.gmra.mxu0 %vm420_vm3, %v746_v0 }
 0x3b5   : > { %v822_v25 = vpop.f32.mrf.mxu0 }
 0x3b6   : > { %v823_v26 = vadd.f32 %v822_v25, %v749_v49 }
 0x3b7   : > { %v1028_v27 = vpop.f32.mrf.mxu0 }
 0x3b8   : > { %826 = vst [vmem:[%s306_s25] sm:$0xff] %v823_v26 }
 0x3b9 PF: > { %s16_s23 = sadd.s32 1, %s1120_s23   ;;  %s1305_s21 = smov %s1116_s22 }
 0x3ba   : > { %p13_p5 = scmp.ge.s32.totalorder %s16_s23, 4   ;;  %s1306_s22 = smov %s1308_s24 }
 0x3bc   :  { %15 = sbr.rel (!%p13_p5) target bundleno = 2 (0x2), region = 89 }

</bundles_post_ra>
